<compile_context>
chip_gen: v7x
topology: tpu7x:2x2x1
jax: 0.10.0
libtpu: 0.0.40
codegen_flags: <defaults>
</compile_context>

<pallas_src>
import jax
import jax.numpy as jnp
from jax.experimental import pallas as pl
from jax.experimental.pallas import tpu as pltpu

HIDDEN_PAD = 128   # hidden width 56 zero-padded to a full lane tile (done once at init)


def _qnet_kernel(x_ref, w1_ref, b1_ref, w2_ref, b2_ref, o_ref):
    # x_ref:  (TM, 4)          -- one batch tile
    # w1_ref: (4, 128)  b1_ref: (1, 128)   -- resident, hidden padded to 128 lanes
    # w2_ref: (128, 2)  b2_ref: (1, 2)     -- resident, narrow output
    # o_ref:  (TM, 2)          -- narrow output tile (minimal HBM writeback)
    x = x_ref[...]
    h = jnp.dot(x, w1_ref[...], preferred_element_type=jnp.float32)   # MXU
    h = jnp.maximum(h + b1_ref[...], 0.0)                             # VPU bias + ReLU
    o = jnp.dot(h, w2_ref[...], preferred_element_type=jnp.float32)   # MXU (N=2)
    o_ref[...] = (o + b2_ref[...]).astype(o_ref.dtype)


def prepare_params(w1, b1, w2, b2):
    """One-time parameter prep: pad hidden dim to 128 lanes, reshape biases to 2-D.
    Call once at init / load time; pass the result to q_net_forward every step."""
    in_size, hidden = w1.shape
    out_size = w2.shape[1]
    w1p = jnp.zeros((in_size, HIDDEN_PAD), jnp.float32).at[:, :hidden].set(w1)
    b1p = jnp.zeros((1, HIDDEN_PAD), jnp.float32).at[0, :hidden].set(b1)
    w2p = jnp.zeros((HIDDEN_PAD, out_size), jnp.float32).at[:hidden, :].set(w2)
    b2p = b2.reshape(1, out_size).astype(jnp.float32)
    return w1p, b1p, w2p, b2p


def _choose_tiling(B, tm_max):
    """Batch tile size with <= ~8*n_steps rows of padding; >=2 grid steps when B>=16
    so v7x can shard the batch axis across both TensorCores."""
    n_steps = max(1, -(-B // tm_max))          # cdiv(B, tm_max)
    if n_steps == 1 and B >= 16:
        n_steps = 2                            # give the second TC work on v7x
    tm = -(-B // n_steps)                      # cdiv(B, n_steps)
    tm = ((tm + 7) // 8) * 8                   # sublane multiple
    b_pad = n_steps * tm
    return tm, b_pad, n_steps


def q_net_forward(x, w1p, b1p, w2p, b2p, *, tm_max=2048):
    """x: (B, Input_size) f32; padded params from prepare_params().
    Returns (B*Out//2, 2) f32, matching PyTorch's x.view((-1, 2))."""
    B, in_size = x.shape
    out_size = w2p.shape[1]

    tm, b_pad, n_steps = _choose_tiling(B, tm_max)
    xp = x if b_pad == B else jnp.pad(x, ((0, b_pad - B), (0, 0)))

    # Honest bytes_accessed: x read + narrow output write + resident params (once).
    cost = pl.CostEstimate(
        flops=2 * b_pad * (in_size * HIDDEN_PAD + HIDDEN_PAD * out_size),
        transcendentals=0,
        bytes_accessed=4 * (b_pad * in_size + b_pad * out_size
                            + in_size * HIDDEN_PAD + HIDDEN_PAD
                            + HIDDEN_PAD * out_size + out_size),
    )

    out = pl.pallas_call(
        _qnet_kernel,
        out_shape=jax.ShapeDtypeStruct((b_pad, out_size), jnp.float32),
        grid_spec=pltpu.PrefetchScalarGridSpec(
            num_scalar_prefetch=0,
            grid=(n_steps,),
            in_specs=[
                pl.BlockSpec((tm, in_size), lambda i: (i, 0)),             # x tile
                pl.BlockSpec((in_size, HIDDEN_PAD), lambda i: (0, 0)),     # w1 (resident)
                pl.BlockSpec((1, HIDDEN_PAD), lambda i: (0, 0)),           # b1 (resident)
                pl.BlockSpec((HIDDEN_PAD, out_size), lambda i: (0, 0)),    # w2 (resident)
                pl.BlockSpec((1, out_size), lambda i: (0, 0)),             # b2 (resident)
            ],
            out_specs=pl.BlockSpec((tm, out_size), lambda i: (i, 0)),      # narrow output
        ),
        compiler_params=pltpu.CompilerParams(
            dimension_semantics=("parallel",),   # lets v7x shard batch across its 2 TCs
        ),
        cost_estimate=cost,
    )(xp, w1p, b1p, w2p, b2p)

    # Drop batch padding, then match PyTorch `x.view((-1, 2))`.
    return out[:B].reshape(-1, 2)


q_net_forward_jit = jax.jit(q_net_forward, static_argnames=("tm_max",))


def init_params(key, input_size=4, w1_size=56, output_size=2):
    """Deterministic init mimicking nn.Linear default (uniform +/- 1/sqrt(fan_in))."""
    k1, k2, k3, k4 = jax.random.split(key, 4)
    bound1 = 1.0 / jnp.sqrt(jnp.float32(input_size))
    bound2 = 1.0 / jnp.sqrt(jnp.float32(w1_size))
    w1 = jax.random.uniform(k1, (input_size, w1_size), jnp.float32, -bound1, bound1)
    b1 = jax.random.uniform(k2, (w1_size,), jnp.float32, -bound1, bound1)
    w2 = jax.random.uniform(k3, (w1_size, output_size), jnp.float32, -bound2, bound2)
    b2 = jax.random.uniform(k4, (output_size,), jnp.float32, -bound2, bound2)
    return w1, b1, w2, b2


if __name__ == "__main__":
    key = jax.random.PRNGKey(0)
    kx, kp = jax.random.split(key)

    batch = 8
    input_size, w1_size, output_size = 4, 56, 2

    x = jax.random.normal(kx, (batch, input_size), jnp.float32)
    w1, b1, w2, b2 = init_params(kp, input_size, w1_size, output_size)

    # One-time parameter prep (padding done here, NOT per forward).
    params = prepare_params(w1, b1, w2, b2)

    y = q_net_forward_jit(x, *params)
    jax.block_until_ready(y)

    # Reference check in plain JAX.
    ref = (jnp.maximum(x @ w1 + b1, 0.0) @ w2 + b2).reshape(-1, 2)
    assert y.shape == (batch, 2), y.shape
    assert jnp.allclose(y, ref, atol=1e-5, rtol=1e-5), "mismatch vs reference"

    # Batch that is not a multiple of the tile and forces the 2-step grid path.
    x2 = jax.random.normal(jax.random.PRNGKey(1), (37, input_size), jnp.float32)
    y2 = q_net_forward_jit(x2, *params)
    jax.block_until_ready(y2)
    ref2 = (jnp.maximum(x2 @ w1 + b1, 0.0) @ w2 + b2).reshape(-1, 2)
    assert y2.shape == (37, 2), y2.shape
    assert jnp.allclose(y2, ref2, atol=1e-5, rtol=1e-5), "mismatch vs reference (padded batch)"

    # Larger batch exercising the big-tile path.
    x3 = jax.random.normal(jax.random.PRNGKey(2), (1025, input_size), jnp.float32)
    y3 = q_net_forward_jit(x3, *params)
    jax.block_until_ready(y3)
    ref3 = (jnp.maximum(x3 @ w1 + b1, 0.0) @ w2 + b2).reshape(-1, 2)
    assert y3.shape == (1025, 2), y3.shape
    assert jnp.allclose(y3, ref3, atol=1e-5, rtol=1e-5), "mismatch vs reference (large batch)"

    print("KERNEL_OK")
</pallas_src>

<mosaic_0001>
module attributes {stable_mosaic.version = 11 : i64} {
  func.func @_qnet_kernel(%arg0: i32, %arg1: memref<8x4xf32, #tpu.memory_space<vmem>>, %arg2: memref<4x128xf32, #tpu.memory_space<vmem>>, %arg3: memref<1x128xf32, #tpu.memory_space<vmem>>, %arg4: memref<128x2xf32, #tpu.memory_space<vmem>>, %arg5: memref<1x2xf32, #tpu.memory_space<vmem>>, %arg6: memref<8x2xf32, #tpu.memory_space<vmem>>) attributes {dimension_semantics = [#tpu.dimension_semantics<parallel>], iteration_bounds = array<i64: 1>, scalar_prefetch = 0 : i64, scratch_operands = 0 : i64, tpu.core_type = #tpu.core_type<tc>, window_params = [{transform_indices = @transform_0, window_bounds = array<i64: 8, 4>}, {pipeline_mode = #tpu.pipeline_mode<synchronous>, transform_indices = @transform_1, window_bounds = array<i64: 4, 128>}, {pipeline_mode = #tpu.pipeline_mode<synchronous>, transform_indices = @transform_2, window_bounds = array<i64: 1, 128>}, {pipeline_mode = #tpu.pipeline_mode<synchronous>, transform_indices = @transform_3, window_bounds = array<i64: 128, 2>}, {pipeline_mode = #tpu.pipeline_mode<synchronous>, transform_indices = @transform_4, window_bounds = array<i64: 1, 2>}, {transform_indices = @transform_5, window_bounds = array<i64: 8, 2>}]} {
    %c0 = arith.constant 0 : index
    %c0_0 = arith.constant 0 : index
    %0 = vector.load %arg1[%c0, %c0_0] : memref<8x4xf32, #tpu.memory_space<vmem>>, vector<8x4xf32>
    %c0_1 = arith.constant 0 : index
    %c0_2 = arith.constant 0 : index
    %1 = vector.load %arg2[%c0_1, %c0_2] : memref<4x128xf32, #tpu.memory_space<vmem>>, vector<4x128xf32>
    %cst = arith.constant dense<0.000000e+00> : vector<8x128xf32>
    %2 = tpu.matmul %0, %1, %cst {dimension_numbers = #tpu.dot_dimension_numbers<[1], [0], [0], [1], [0, 0, 1, 1], [], []>} : vector<8x4xf32>, vector<4x128xf32>, vector<8x128xf32> -> vector<8x128xf32>
    %c0_3 = arith.constant 0 : index
    %c0_4 = arith.constant 0 : index
    %3 = vector.load %arg3[%c0_3, %c0_4] : memref<1x128xf32, #tpu.memory_space<vmem>>, vector<1x128xf32>
    %4 = vector.broadcast %3 : vector<1x128xf32> to vector<8x128xf32>
    %5 = arith.addf %2, %4 : vector<8x128xf32>
    %cst_5 = arith.constant 0.000000e+00 : f32
    %6 = vector.broadcast %cst_5 : f32 to vector<8x128xf32>
    %7 = arith.maximumf %5, %6 : vector<8x128xf32>
    %c0_6 = arith.constant 0 : index
    %c0_7 = arith.constant 0 : index
    %8 = vector.load %arg4[%c0_6, %c0_7] : memref<128x2xf32, #tpu.memory_space<vmem>>, vector<128x2xf32>
    %cst_8 = arith.constant dense<0.000000e+00> : vector<8x2xf32>
    %9 = tpu.matmul %7, %8, %cst_8 {dimension_numbers = #tpu.dot_dimension_numbers<[1], [0], [0], [1], [0, 0, 1, 1], [], []>} : vector<8x128xf32>, vector<128x2xf32>, vector<8x2xf32> -> vector<8x2xf32>
    %c0_9 = arith.constant 0 : index
    %c0_10 = arith.constant 0 : index
    %10 = vector.load %arg5[%c0_9, %c0_10] : memref<1x2xf32, #tpu.memory_space<vmem>>, vector<1x2xf32>
    %11 = vector.broadcast %10 : vector<1x2xf32> to vector<8x2xf32>
    %12 = arith.addf %9, %11 : vector<8x2xf32>
    %c0_11 = arith.constant 0 : index
    %c0_12 = arith.constant 0 : index
    %13 = vector.load %arg6[%c0_11, %c0_12] : memref<8x2xf32, #tpu.memory_space<vmem>>, vector<8x2xf32>
    tpu.vector_store %arg6[%c0_11, %c0_12], %12 {strides = array<i32>} : memref<8x2xf32, #tpu.memory_space<vmem>>, vector<8x2xf32>,
    return
  }
  func.func @transform_0(%arg0: i32) -> (i32, i32) {
    %c0_i32 = arith.constant 0 : i32
    %c0_i32_0 = arith.constant 0 : i32
    return %arg0, %c0_i32 : i32, i32
  }
  func.func @transform_1(%arg0: i32) -> (i32, i32) {
    %c0_i32 = arith.constant 0 : i32
    %c0_i32_0 = arith.constant 0 : i32
    %c0_i32_1 = arith.constant 0 : i32
    return %c0_i32, %c0_i32_0 : i32, i32
  }
  func.func @transform_2(%arg0: i32) -> (i32, i32) {
    %c0_i32 = arith.constant 0 : i32
    %c0_i32_0 = arith.constant 0 : i32
    %c0_i32_1 = arith.constant 0 : i32
    return %c0_i32, %c0_i32_0 : i32, i32
  }
  func.func @transform_3(%arg0: i32) -> (i32, i32) {
    %c0_i32 = arith.constant 0 : i32
    %c0_i32_0 = arith.constant 0 : i32
    %c0_i32_1 = arith.constant 0 : i32
    return %c0_i32, %c0_i32_0 : i32, i32
  }
  func.func @transform_4(%arg0: i32) -> (i32, i32) {
    %c0_i32 = arith.constant 0 : i32
    %c0_i32_0 = arith.constant 0 : i32
    %c0_i32_1 = arith.constant 0 : i32
    return %c0_i32, %c0_i32_0 : i32, i32
  }
  func.func @transform_5(%arg0: i32) -> (i32, i32) {
    %c0_i32 = arith.constant 0 : i32
    %c0_i32_0 = arith.constant 0 : i32
    return %arg0, %c0_i32 : i32, i32
  }
}

</mosaic_0001>

<bundles_post_ra>
// kernel: q_net_forward.1
= control target key start
LH: loop header
LB: loop body
LE: loop exit
PB: predicated region body
PF: predicated region fallthrough
CT: control target
= control target key end

     0   :  { %vm33_vm0 = vcmask 1043456   ;;  %vm29_vm1 = vcmask 31744   ;;  %v297_v0 = vmov 0.0   ;;  %vm298_vm2 = vmmov 0   ;;  %s393_s1 = inlined_call_operand.vmem [shape: f32[4,128], index: 1, kind: input, shape index: {}]   ;;  %s394_s0 = inlined_call_operand.vmem [shape: f32[8,4], index: 0, kind: input, shape index: {}]   ;;  %s395_s3 = inlined_call_operand.vmem [shape: f32[128,2], index: 3, kind: input, shape index: {}]   ;;  %s396_s2 = inlined_call_operand.vmem [shape: f32[1,128], index: 2, kind: input, shape index: {}]   ;;  %s397_s4 = inlined_call_operand.vmem [shape: f32[1,2], index: 4, kind: input, shape index: {}]   ;;  %s398_s5 = inlined_call_operand.vmem [shape: f32[8,2], index: 5, kind: output, shape index: {}]  }
   0x1   :  { %230 = vmatprep.subr.mxu0 %v297_v0  ;;  %v21_v1 = vld [vmem:[%s393_s1] sm:$0xf]  ;;  %232 = vmatprep.mubr.msk.f32.mxu0 %vm298_vm2, %v297_v0  ;;  %v299_v4 = vmov 0.0|0.0   ;;  %v109_v5 = vld [vmem:[%s395_s3 + $0x8] sm:$0xff]  ;;  %v110_v6 = vld [vmem:[%s395_s3 + $0x10] sm:$0xff]  ;;  %vm201_vm3 = vcmask 15360  }
   0x2   :  { %v20_v2 = vld [vmem:[%s394_s0] sm:$0xff]  ;;  %231 = vmatpush3.msk.msra.mxu0 %vm33_vm0, %v21_v1  ;;  %270 = vmatprep.subr.bf16.mxu1 %v299_v4  ;;  %v111_v7 = vld [vmem:[%s395_s3 + $0x18] sm:$0xff]  ;;  %v113_v11 = vld [vmem:[%s395_s3 + $0x28] sm:$0xff] }
   0x3   :  { %v108_v3 = vld [vmem:[%s395_s3] sm:$0xff]  ;;  %233 = vmatmul.mubr.msk.f32.vlgmr.msra.gmra.mrb[0].mxu0 %vm29_vm1, %v20_v2  ;;  %267 = vmatprep.mubr.msk.f32.mxu1 %vm298_vm2, %v297_v0  ;;  %v274_v9 = vpack.c.bf16 %v111_v7, %v110_v6  ;;  %v114_v13 = vld [vmem:[%s395_s3 + $0x30] sm:$0xff]  ;;  %v115_v14 = vld [vmem:[%s395_s3 + $0x38] sm:$0xff] }
   0x4   :  { %v271_v8 = vpack.c.bf16 %v109_v5, %v108_v3  ;;  %v112_v10 = vld [vmem:[%s395_s3 + $0x20] sm:$0xff]  ;;  %v280_v15 = vpack.c.bf16 %v115_v14, %v114_v13  ;;  %v117_v17 = vld [vmem:[%s395_s3 + $0x48] sm:$0xff]  ;;  %v118_v19 = vld [vmem:[%s395_s3 + $0x50] sm:$0xff] }
   0x5   :  { %v277_v12 = vpack.c.bf16 %v113_v11, %v112_v10  ;;  %v116_v16 = vld [vmem:[%s395_s3 + $0x40] sm:$0xff]  ;;  %v119_v20 = vld [vmem:[%s395_s3 + $0x58] sm:$0xff]  ;;  %v121_v23 = vld [vmem:[%s395_s3 + $0x68] sm:$0xff] }
   0x6   :  { %272 = vmatpush3.bf16.msra.mxu1 %v271_v8  ;;  %v283_v18 = vpack.c.bf16 %v117_v17, %v116_v16  ;;  %v286_v21 = vpack.c.bf16 %v119_v20, %v118_v19  ;;  %v120_v22 = vld [vmem:[%s395_s3 + $0x60] sm:$0xff]  ;;  %v122_v25 = vld [vmem:[%s395_s3 + $0x70] sm:$0xff]  ;;  %v123_v26 = vld [vmem:[%s395_s3 + $0x78] sm:$0xff] }
   0x7   :  { %273 = vmatprep.subr.bf16.mxu1 %v299_v4  ;;  %v289_v24 = vpack.c.bf16 %v121_v23, %v120_v22  ;;  %v292_v27 = vpack.c.bf16 %v123_v26, %v122_v25  ;;  %v207_v28 = vld [vmem:[%s396_s2] ss:$0 sm:$0xff] }
   0x8   :  { %v210_v33 = vld [vmem:[%s397_s4] ss:$0 sm:$0xff] }
   0xa   :  { %275 = vmatpush3.bf16.msra.mxu1 %v274_v9 }
   0xb   :  { %276 = vmatprep.subr.bf16.mxu1 %v299_v4 }
   0xe   :  { %278 = vmatpush3.bf16.msra.mxu1 %v277_v12 }
   0xf   :  { %279 = vmatprep.subr.bf16.mxu1 %v299_v4 }
  0x12   :  { %281 = vmatpush3.bf16.msra.mxu1 %v280_v15 }
  0x13   :  { %282 = vmatprep.subr.bf16.mxu1 %v299_v4 }
  0x16   :  { %284 = vmatpush3.bf16.msra.mxu1 %v283_v18 }
  0x17   :  { %285 = vmatprep.subr.bf16.mxu1 %v299_v4 }
  0x1a   :  { %287 = vmatpush3.bf16.msra.mxu1 %v286_v21 }
  0x1b   :  { %288 = vmatprep.subr.bf16.mxu1 %v299_v4 }
  0x1e   :  { %290 = vmatpush3.bf16.msra.mxu1 %v289_v24 }
  0x1f   :  { %291 = vmatprep.subr.bf16.mxu1 %v299_v4 }
  0x22   :  { %293 = vmatpush3.bf16.msra.mxu1 %v292_v27 }
  0xd6   :  { %v103_v29 = vpop.f32.mrb[0].mxu0 }
  0xd7   :  { %v104_v30 = vadd.f32 %v207_v28, %v103_v29  ;;  %v234_v31 = vpop.f32.mrb[1].mxu0 }
  0xd9   :  { %v107_v32 = vmax.f32 %v104_v30, 0.0 }
  0xdb   :  { %268 = vmatmul.mubr.f32.vlgmr.msra.gmra.mrb[0].mxu1 %v107_v32 }
 0x1ae   :  { %v197_v34 = vpop.f32.mrb[0].mxu1 }
 0x1af   :  { %v198_v35 = vadd.f32 %v210_v33, %v197_v34  ;;  %v269_v36 = vpop.f32.mrb[1].mxu1 }
 0x1b1   :  { %202 = vst.msk [vmem:[%s398_s5] sm:$0xff] %vm201_vm3, %v198_v35 }

</bundles_post_ra>
